<compile_context>
chip_gen: v7x
topology: tpu7x:2x2x1
jax: 0.10.0
libtpu: 0.0.40
codegen_flags: <defaults>
</compile_context>

<pallas_src>
import math
import functools

import jax
import jax.numpy as jnp
from jax import lax
from jax.experimental import pallas as pl
from jax.experimental.pallas import tpu as pltpu

_MIB = 1 << 20


def _round_up(x, m):
    return ((x + m - 1) // m) * m


# (target token tile, physical VMEM, TensorCores per chip)
_GEN_DEFAULTS = {
    "v5e":     (256, 128 * _MIB, 1),   # break-even tile_m ~240 -> 256 is right
    "v6e":     (768, 128 * _MIB, 1),   # break-even tile_m ~650
    "v7x":     (512, 64 * _MIB, 2),    # smaller VMEM, 2 TCs share the token axis
    "unknown": (256, 64 * _MIB, 1),
}


def _tpu_generation():
    try:
        kind = jax.devices()[0].device_kind.lower()
    except Exception:
        return "unknown"
    if "v5 lite" in kind or "v5e" in kind or "v5lite" in kind:
        return "v5e"
    if "v6" in kind:
        return "v6e"
    if "7" in kind:
        return "v7x"
    return "unknown"


def _ffn_kernel(x_ref, w1_ref, b1_ref, w2_ref, b2_ref, gamma_ref, beta_ref,
                o_ref, *, eps, n_chunks):
    # x_ref: (TM, H) f32; w1: (H, TI) bf16; b1: (1, TI) f32
    # w2: (TI, H) bf16; b2/gamma/beta: (1, H) f32; o_ref: (TM, H) f32

    # dense1 chunk on the MXU: bf16 operands, f32 accumulation
    xb = x_ref[...].astype(jnp.bfloat16)
    h = jnp.dot(xb, w1_ref[...], preferred_element_type=jnp.float32) + b1_ref[...]

    # exact (erf) GELU -- matches torch.nn.functional.gelu default.
    # Kept in f32: v5e VPU/EUP have no bf16; on v6e/v7x a bf16 GELU only pays
    # off if a bundle dump shows VALU saturating.
    h = 0.5 * h * (1.0 + lax.erf(h * (1.0 / math.sqrt(2.0))))

    # dense2 chunk, accumulated straight into the resident f32 output block
    part = jnp.dot(h.astype(jnp.bfloat16), w2_ref[...],
                   preferred_element_type=jnp.float32)

    def _epilogue(y):
        # dropout: module evaluated in inference mode -> identity
        # TODO(synk): training-mode dropout (pltpu.prng_random_bits mask) not emitted.
        mean = jnp.mean(y, axis=-1, keepdims=True)
        var = jnp.mean((y - mean) * (y - mean), axis=-1, keepdims=True)
        return (y - mean) * lax.rsqrt(var + eps) * gamma_ref[...] + beta_ref[...]

    # TODO(synk): for tiny H (<128) a lane-dense (tile_m*H/128, 128) output slab
    # would avoid masked vst.msk stores; irrelevant for production H >= 128.
    if n_chunks == 1:
        # weights fully resident -> single pass, no accumulator machinery
        o_ref[...] = _epilogue(part + b2_ref[...]).astype(o_ref.dtype)
    else:
        k = pl.program_id(1)

        @pl.when(k == 0)
        def _init():
            o_ref[...] = jnp.zeros(o_ref.shape, o_ref.dtype)

        o_ref[...] += part

        @pl.when(k == n_chunks - 1)
        def _finalize():
            o_ref[...] = _epilogue(o_ref[...] + b2_ref[...]).astype(o_ref.dtype)


def _vmem_bytes(tile_m, H, tile_i):
    """Rough per-step VMEM footprint: double-buffered tiles + in-kernel temps."""
    return (2 * tile_m * H * 4        # x tiles (f32, double-buffered)
            + 2 * tile_m * H * 4      # out tiles (f32, double-buffered)
            + 4 * H * tile_i * 2      # W1 + W2 chunks (bf16, double-buffered)
            + 4 * tile_i * 4          # b1 chunks
            + 6 * H * 4               # b2 / gamma / beta
            + tile_m * H * 2          # bf16 copy of the x tile
            + tile_m * tile_i * 6)    # GELU slab (f32) + its bf16 copy


def _choose_tile_i(I, H, budget):
    # Keep W1/W2 fully resident (grid-invariant index_maps -> one DMA total)
    # whenever the double-buffered bf16 weights fit comfortably.
    if 4 * H * I * 2 <= min(48 * _MIB, budget // 2):
        return I, I
    # Otherwise chunk the intermediate dim with an MXU-aligned divisor of I;
    # NEVER fall back to tile_i = I (full-width weights blow VMEM for large I).
    for cand in (512, 256, 384, 128):
        if I % cand == 0:
            return cand, I
    # Last resort: pad I.  Zero-padded W1 cols / b1 / W2 rows contribute
    # exactly 0 through GELU and dense2, so numerics are unchanged.
    return 256, _round_up(I, 256)


def feed_forward(x, w1, b1, w2, b2, gamma, beta, *, eps=1e-12,
                 tile_m=None, tile_i=None):
    """x: [B, S, H]; w1: [H, I]; b1: [I]; w2: [I, H]; b2/gamma/beta: [H].

    Weights may be pre-cast to bf16 once at load time (no per-call cast pass);
    x is passed unconverted and cast to bf16 inside the kernel.
    """
    B, S, H = x.shape
    I = w1.shape[1]
    M = B * S

    gen = _tpu_generation()
    tile_m_default, vmem_physical, n_cores = _GEN_DEFAULTS[gen]
    # VMEM clamp with headroom for Mosaic internal scratch:
    # ~100 MiB on 128 MiB parts (v5e/v6e), ~56 MiB on v7x's 64 MiB.
    budget = (100 * _MIB if vmem_physical >= 128 * _MIB
              else vmem_physical - 8 * _MIB)

    # ---- intermediate-dim chunking --------------------------------------
    if tile_i is None:
        tile_i_eff, I_pad = _choose_tile_i(I, H, budget)
    else:
        tile_i_eff = tile_i
        I_pad = _round_up(I, tile_i_eff)
    n_i = I_pad // tile_i_eff

    # ---- token tiling -----------------------------------------------------
    tile_m_target = tile_m if tile_m is not None else tile_m_default
    tile_m_eff = min(tile_m_target, _round_up(M, 8))
    tile_m_eff = max(8, (tile_m_eff // 8) * 8)
    if n_cores > 1 and M > 8:
        # keep >= 2 token tiles so both v7x TensorCores get work
        half = _round_up((M + n_cores - 1) // n_cores, 8)
        tile_m_eff = min(tile_m_eff, max(8, half))
    # shrink until the double-buffered working set fits the VMEM budget
    while tile_m_eff > 8 and _vmem_bytes(tile_m_eff, H, tile_i_eff) > budget - 2 * _MIB:
        tile_m_eff -= 8
    M_pad = _round_up(M, tile_m_eff)
    n_m = M_pad // tile_m_eff

    # ---- operand prep (no redundant per-call HBM passes) -------------------
    x2 = x.reshape(M, H)
    if M_pad != M:
        x2 = jnp.pad(x2, ((0, M_pad - M), (0, 0)))
    w1_bf = w1 if w1.dtype == jnp.bfloat16 else w1.astype(jnp.bfloat16)
    w2_bf = w2 if w2.dtype == jnp.bfloat16 else w2.astype(jnp.bfloat16)
    b1_2d = b1.reshape(1, I).astype(jnp.float32)
    if I_pad != I:
        w1_bf = jnp.pad(w1_bf, ((0, 0), (0, I_pad - I)))
        w2_bf = jnp.pad(w2_bf, ((0, I_pad - I), (0, 0)))
        b1_2d = jnp.pad(b1_2d, ((0, 0), (0, I_pad - I)))
    b2_2d = b2.reshape(1, H).astype(jnp.float32)
    gamma_2d = gamma.reshape(1, H).astype(jnp.float32)
    beta_2d = beta.reshape(1, H).astype(jnp.float32)

    kernel = functools.partial(_ffn_kernel, eps=eps, n_chunks=n_i)

    # honest bytes estimate: weights are streamed once if resident, otherwise
    # once per token tile
    weight_bytes = 2 * H * I_pad * 2 + (I_pad + 3 * H) * 4
    weight_passes = 1 if n_i == 1 else n_m

    out = pl.pallas_call(
        kernel,
        out_shape=jax.ShapeDtypeStruct((M_pad, H), jnp.float32),
        grid_spec=pltpu.PrefetchScalarGridSpec(
            num_scalar_prefetch=0,
            grid=(n_m, n_i),                     # (token tiles, intermediate chunks)
            in_specs=[
                pl.BlockSpec((tile_m_eff, H), lambda i, k: (i, 0)),      # x
                # TODO(synk): if xprof shows exposed weight DMA with n_i > 1 on
                # v6e, add pipeline_mode=pl.Buffered(3) to the W1/W2 specs.
                pl.BlockSpec((H, tile_i_eff), lambda i, k: (0, k)),      # W1 chunk
                pl.BlockSpec((1, tile_i_eff), lambda i, k: (0, k)),      # b1 chunk
                pl.BlockSpec((tile_i_eff, H), lambda i, k: (k, 0)),      # W2 chunk
                pl.BlockSpec((1, H), lambda i, k: (0, 0)),               # b2
                pl.BlockSpec((1, H), lambda i, k: (0, 0)),               # LN gamma
                pl.BlockSpec((1, H), lambda i, k: (0, 0)),               # LN beta
            ],
            out_specs=pl.BlockSpec((tile_m_eff, H), lambda i, k: (i, 0)),
        ),
        compiler_params=pltpu.CompilerParams(
            dimension_semantics=("parallel", "arbitrary"),
            vmem_limit_bytes=int(budget)),
        cost_estimate=pl.CostEstimate(
            flops=4 * M_pad * H * I_pad,
            transcendentals=M_pad * I_pad,
            bytes_accessed=(M_pad * H * (4 + 4)          # x in (f32) + out (f32)
                            + weight_passes * weight_bytes)),
    )(x2, w1_bf, b1_2d, w2_bf, b2_2d, gamma_2d, beta_2d)

    return out[:M].reshape(B, S, H).astype(x.dtype)


def _reference_f32(x, w1, b1, w2, b2, gamma, beta, eps):
    h = x @ w1 + b1
    h = 0.5 * h * (1.0 + lax.erf(h / jnp.sqrt(2.0)))
    y = h @ w2 + b2
    mean = y.mean(-1, keepdims=True)
    var = ((y - mean) ** 2).mean(-1, keepdims=True)
    return (y - mean) / jnp.sqrt(var + eps) * gamma + beta


def _reference_bf16(x, w1, b1, w2, b2, gamma, beta, eps):
    # emulates the kernel's precision: bf16 MXU operands, f32 accumulate/epilogue
    xb, w1b, w2b = (x.astype(jnp.bfloat16), w1.astype(jnp.bfloat16),
                    w2.astype(jnp.bfloat16))
    h = jnp.dot(xb, w1b, preferred_element_type=jnp.float32) + b1
    h = 0.5 * h * (1.0 + lax.erf(h / jnp.sqrt(2.0)))
    y = jnp.dot(h.astype(jnp.bfloat16), w2b, preferred_element_type=jnp.float32) + b2
    mean = y.mean(-1, keepdims=True)
    var = ((y - mean) ** 2).mean(-1, keepdims=True)
    return (y - mean) / jnp.sqrt(var + eps) * gamma + beta


if __name__ == "__main__":
    # config: hidden_size=32, intermediate_size=128, layer_norm_eps=1e-12
    B, S, H, I = 2, 8, 32, 128
    eps = 1e-12

    key = jax.random.PRNGKey(0)
    kx, k1, k2, k3, k4 = jax.random.split(key, 5)

    x = jax.random.normal(kx, (B, S, H), dtype=jnp.float32)

    # deterministic parameter init (nn.Linear-style uniform bounds)
    bound1 = 1.0 / math.sqrt(H)
    w1 = jax.random.uniform(k1, (H, I), jnp.float32, -bound1, bound1)
    b1 = jax.random.uniform(k2, (I,), jnp.float32, -bound1, bound1)
    bound2 = 1.0 / math.sqrt(I)
    w2 = jax.random.uniform(k3, (I, H), jnp.float32, -bound2, bound2)
    b2 = jax.random.uniform(k4, (H,), jnp.float32, -bound2, bound2)
    gamma = jnp.ones((H,), jnp.float32)
    beta = jnp.zeros((H,), jnp.float32)

    # pre-cast weights ONCE at "load time" so the kernel wrapper never re-casts
    w1_bf = w1.astype(jnp.bfloat16)
    w2_bf = w2.astype(jnp.bfloat16)

    out = jax.block_until_ready(
        feed_forward(x, w1_bf, b1, w2_bf, b2, gamma, beta, eps=eps))
    assert out.shape == (B, S, H)

    # tight check against a reference that emulates the kernel's bf16 MXU path
    ref_bf16 = _reference_bf16(x, w1, b1, w2, b2, gamma, beta, eps)
    assert jnp.allclose(out, ref_bf16, atol=2e-3, rtol=2e-3), \
        "mismatch vs bf16-emulating reference"

    # loose check against the exact f32 torch semantics
    ref_f32 = _reference_f32(x, w1, b1, w2, b2, gamma, beta, eps)
    assert jnp.allclose(out, ref_f32, atol=1e-1, rtol=1e-1), \
        "mismatch vs f32 reference"

    # ragged-token (padding) path: M = 15 -> padded up to a tile multiple
    x_odd = jax.random.normal(jax.random.PRNGKey(1), (3, 5, H), jnp.float32)
    out_odd = jax.block_until_ready(
        feed_forward(x_odd, w1_bf, b1, w2_bf, b2, gamma, beta, eps=eps))
    ref_odd = _reference_bf16(x_odd, w1, b1, w2, b2, gamma, beta, eps)
    assert out_odd.shape == (3, 5, H)
    assert jnp.allclose(out_odd, ref_odd, atol=2e-3, rtol=2e-3), \
        "mismatch vs reference (ragged token count)"

    # chunked-intermediate path (n_i > 1): exercises the accumulate-into-output
    # machinery that large models hit when the weights do not fit in VMEM
    I2 = 256
    kk = jax.random.split(jax.random.PRNGKey(2), 4)
    w1b = jax.random.uniform(kk[0], (H, I2), jnp.float32, -bound1, bound1)
    b1b = jax.random.uniform(kk[1], (I2,), jnp.float32, -bound1, bound1)
    bound2b = 1.0 / math.sqrt(I2)
    w2b = jax.random.uniform(kk[2], (I2, H), jnp.float32, -bound2b, bound2b)
    b2b = jax.random.uniform(kk[3], (H,), jnp.float32, -bound2b, bound2b)
    out_chunk = jax.block_until_ready(
        feed_forward(x, w1b, b1b, w2b, b2b, gamma, beta, eps=eps, tile_i=128))
    ref_chunk = _reference_bf16(x, w1b, b1b, w2b, b2b, gamma, beta, eps)
    assert jnp.allclose(out_chunk, ref_chunk, atol=2e-3, rtol=2e-3), \
        "mismatch vs reference (chunked intermediate dim)"

    print("KERNEL_OK")
</pallas_src>

<mosaic_0001>
module attributes {stable_mosaic.version = 11 : i64} {
  func.func @_ffn_kernel(%arg0: i32, %arg1: i32, %arg2: memref<16x32xf32, #tpu.memory_space<vmem>>, %arg3: memref<32x128xbf16, #tpu.memory_space<vmem>>, %arg4: memref<1x128xf32, #tpu.memory_space<vmem>>, %arg5: memref<128x32xbf16, #tpu.memory_space<vmem>>, %arg6: memref<1x32xf32, #tpu.memory_space<vmem>>, %arg7: memref<1x32xf32, #tpu.memory_space<vmem>>, %arg8: memref<1x32xf32, #tpu.memory_space<vmem>>, %arg9: memref<16x32xf32, #tpu.memory_space<vmem>>) attributes {dimension_semantics = [#tpu.dimension_semantics<parallel>, #tpu.dimension_semantics<arbitrary>], iteration_bounds = array<i64: 1, 1>, scalar_prefetch = 0 : i64, scratch_operands = 0 : i64, tpu.core_type = #tpu.core_type<tc>, window_params = [{transform_indices = @transform_0, window_bounds = array<i64: 16, 32>}, {transform_indices = @transform_1, window_bounds = array<i64: 32, 128>}, {transform_indices = @transform_2, window_bounds = array<i64: 1, 128>}, {transform_indices = @transform_3, window_bounds = array<i64: 128, 32>}, {pipeline_mode = #tpu.pipeline_mode<synchronous>, transform_indices = @transform_4, window_bounds = array<i64: 1, 32>}, {pipeline_mode = #tpu.pipeline_mode<synchronous>, transform_indices = @transform_5, window_bounds = array<i64: 1, 32>}, {pipeline_mode = #tpu.pipeline_mode<synchronous>, transform_indices = @transform_6, window_bounds = array<i64: 1, 32>}, {transform_indices = @transform_7, window_bounds = array<i64: 16, 32>}]} {
    %c0 = arith.constant 0 : index
    %c0_0 = arith.constant 0 : index
    %0 = vector.load %arg2[%c0, %c0_0] : memref<16x32xf32, #tpu.memory_space<vmem>>, vector<16x32xf32>
    %1 = arith.truncf %0 : vector<16x32xf32> to vector<16x32xbf16>
    %c0_1 = arith.constant 0 : index
    %c0_2 = arith.constant 0 : index
    %2 = vector.load %arg3[%c0_1, %c0_2] : memref<32x128xbf16, #tpu.memory_space<vmem>>, vector<32x128xbf16>
    %cst = arith.constant dense<0.000000e+00> : vector<16x128xf32>
    %3 = tpu.matmul %1, %2, %cst {dimension_numbers = #tpu.dot_dimension_numbers<[1], [0], [0], [1], [0, 0, 1, 1], [], []>} : vector<16x32xbf16>, vector<32x128xbf16>, vector<16x128xf32> -> vector<16x128xf32>
    %c0_3 = arith.constant 0 : index
    %c0_4 = arith.constant 0 : index
    %4 = vector.load %arg4[%c0_3, %c0_4] : memref<1x128xf32, #tpu.memory_space<vmem>>, vector<1x128xf32>
    %5 = vector.broadcast %4 : vector<1x128xf32> to vector<16x128xf32>
    %6 = arith.addf %3, %5 : vector<16x128xf32>
    %cst_5 = arith.constant 5.000000e-01 : f32
    %7 = vector.broadcast %cst_5 : f32 to vector<16x128xf32>
    %8 = arith.mulf %7, %6 : vector<16x128xf32>
    %cst_6 = arith.constant 0.707106769 : f32
    %9 = vector.broadcast %cst_6 : f32 to vector<16x128xf32>
    %10 = arith.mulf %6, %9 : vector<16x128xf32>
    %11 = math.erf %10 : vector<16x128xf32>
    %cst_7 = arith.constant 1.000000e+00 : f32
    %12 = vector.broadcast %cst_7 : f32 to vector<16x128xf32>
    %13 = arith.addf %12, %11 : vector<16x128xf32>
    %14 = arith.mulf %8, %13 : vector<16x128xf32>
    %15 = arith.truncf %14 : vector<16x128xf32> to vector<16x128xbf16>
    %c0_8 = arith.constant 0 : index
    %c0_9 = arith.constant 0 : index
    %16 = vector.load %arg5[%c0_8, %c0_9] : memref<128x32xbf16, #tpu.memory_space<vmem>>, vector<128x32xbf16>
    %cst_10 = arith.constant dense<0.000000e+00> : vector<16x32xf32>
    %17 = tpu.matmul %15, %16, %cst_10 {dimension_numbers = #tpu.dot_dimension_numbers<[1], [0], [0], [1], [0, 0, 1, 1], [], []>} : vector<16x128xbf16>, vector<128x32xbf16>, vector<16x32xf32> -> vector<16x32xf32>
    %c0_11 = arith.constant 0 : index
    %c0_12 = arith.constant 0 : index
    %18 = vector.load %arg6[%c0_11, %c0_12] : memref<1x32xf32, #tpu.memory_space<vmem>>, vector<1x32xf32>
    %19 = vector.broadcast %18 : vector<1x32xf32> to vector<16x32xf32>
    %20 = arith.addf %17, %19 : vector<16x32xf32>
    %cst_13 = arith.constant dense<0.000000e+00> : vector<16xf32>
    %21 = vector.multi_reduction <add>, %20, %cst_13 [1] : vector<16x32xf32> to vector<16xf32>
    %22 = vector.shape_cast %21 : vector<16xf32> to vector<16x1xf32>
    %cst_14 = arith.constant 3.200000e+01 : f32
    %23 = vector.broadcast %cst_14 : f32 to vector<16x1xf32>
    %24 = arith.divf %22, %23 : vector<16x1xf32>
    %25 = vector.broadcast %24 : vector<16x1xf32> to vector<16x32xf32>
    %26 = arith.subf %20, %25 : vector<16x32xf32>
    %27 = vector.broadcast %24 : vector<16x1xf32> to vector<16x32xf32>
    %28 = arith.subf %20, %27 : vector<16x32xf32>
    %29 = arith.mulf %26, %28 : vector<16x32xf32>
    %cst_15 = arith.constant dense<0.000000e+00> : vector<16xf32>
    %30 = vector.multi_reduction <add>, %29, %cst_15 [1] : vector<16x32xf32> to vector<16xf32>
    %31 = vector.shape_cast %30 : vector<16xf32> to vector<16x1xf32>
    %cst_16 = arith.constant 3.200000e+01 : f32
    %32 = vector.broadcast %cst_16 : f32 to vector<16x1xf32>
    %33 = arith.divf %31, %32 : vector<16x1xf32>
    %34 = vector.broadcast %24 : vector<16x1xf32> to vector<16x32xf32>
    %35 = arith.subf %20, %34 : vector<16x32xf32>
    %cst_17 = arith.constant 9.99999996E-13 : f32
    %36 = vector.broadcast %cst_17 : f32 to vector<16x1xf32>
    %37 = arith.addf %33, %36 : vector<16x1xf32>
    %38 = math.rsqrt %37 : vector<16x1xf32>
    %39 = vector.broadcast %38 : vector<16x1xf32> to vector<16x32xf32>
    %40 = arith.mulf %35, %39 : vector<16x32xf32>
    %c0_18 = arith.constant 0 : index
    %c0_19 = arith.constant 0 : index
    %41 = vector.load %arg7[%c0_18, %c0_19] : memref<1x32xf32, #tpu.memory_space<vmem>>, vector<1x32xf32>
    %42 = vector.broadcast %41 : vector<1x32xf32> to vector<16x32xf32>
    %43 = arith.mulf %40, %42 : vector<16x32xf32>
    %c0_20 = arith.constant 0 : index
    %c0_21 = arith.constant 0 : index
    %44 = vector.load %arg8[%c0_20, %c0_21] : memref<1x32xf32, #tpu.memory_space<vmem>>, vector<1x32xf32>
    %45 = vector.broadcast %44 : vector<1x32xf32> to vector<16x32xf32>
    %46 = arith.addf %43, %45 : vector<16x32xf32>
    %c0_22 = arith.constant 0 : index
    %c0_23 = arith.constant 0 : index
    %47 = vector.load %arg9[%c0_22, %c0_23] : memref<16x32xf32, #tpu.memory_space<vmem>>, vector<16x32xf32>
    tpu.vector_store %arg9[%c0_22, %c0_23], %46 {strides = array<i32>} : memref<16x32xf32, #tpu.memory_space<vmem>>, vector<16x32xf32>,
    return
  }
  func.func @transform_0(%arg0: i32, %arg1: i32) -> (i32, i32) {
    %c0_i32 = arith.constant 0 : i32
    %c0_i32_0 = arith.constant 0 : i32
    return %arg0, %c0_i32 : i32, i32
  }
  func.func @transform_1(%arg0: i32, %arg1: i32) -> (i32, i32) {
    %c0_i32 = arith.constant 0 : i32
    %c0_i32_0 = arith.constant 0 : i32
    return %c0_i32, %arg1 : i32, i32
  }
  func.func @transform_2(%arg0: i32, %arg1: i32) -> (i32, i32) {
    %c0_i32 = arith.constant 0 : i32
    %c0_i32_0 = arith.constant 0 : i32
    return %c0_i32, %arg1 : i32, i32
  }
  func.func @transform_3(%arg0: i32, %arg1: i32) -> (i32, i32) {
    %c0_i32 = arith.constant 0 : i32
    %c0_i32_0 = arith.constant 0 : i32
    return %arg1, %c0_i32 : i32, i32
  }
  func.func @transform_4(%arg0: i32, %arg1: i32) -> (i32, i32) {
    %c0_i32 = arith.constant 0 : i32
    %c0_i32_0 = arith.constant 0 : i32
    %c0_i32_1 = arith.constant 0 : i32
    return %c0_i32, %c0_i32_0 : i32, i32
  }
  func.func @transform_5(%arg0: i32, %arg1: i32) -> (i32, i32) {
    %c0_i32 = arith.constant 0 : i32
    %c0_i32_0 = arith.constant 0 : i32
    %c0_i32_1 = arith.constant 0 : i32
    return %c0_i32, %c0_i32_0 : i32, i32
  }
  func.func @transform_6(%arg0: i32, %arg1: i32) -> (i32, i32) {
    %c0_i32 = arith.constant 0 : i32
    %c0_i32_0 = arith.constant 0 : i32
    %c0_i32_1 = arith.constant 0 : i32
    return %c0_i32, %c0_i32_0 : i32, i32
  }
  func.func @transform_7(%arg0: i32, %arg1: i32) -> (i32, i32) {
    %c0_i32 = arith.constant 0 : i32
    %c0_i32_0 = arith.constant 0 : i32
    return %arg0, %c0_i32 : i32, i32
  }
}

</mosaic_0001>

<bundles_post_ra>
// kernel: tpu_custom_call.1
= control target key start
LH: loop header
LB: loop body
LE: loop exit
PB: predicated region body
PF: predicated region fallthrough
CT: control target
= control target key end

     0   :  { %v387_v1 = vmov 0.0   ;;  %vm388_vm0 = vmmov 0   ;;  %vm54_vm1 = vcmask 261120   ;;  %s499_s0 = inlined_call_operand.vmem [shape: f32[16,32], index: 0, kind: input, shape index: {}]   ;;  %s500_s1 = inlined_call_operand.vmem [shape: bf16[32,128], index: 1, kind: input, shape index: {}]   ;;  %s501_s2 = inlined_call_operand.vmem [shape: f32[1,128], index: 2, kind: input, shape index: {}]   ;;  %s502_s3 = inlined_call_operand.vmem [shape: bf16[128,32], index: 3, kind: input, shape index: {}]   ;;  %s503_s4 = inlined_call_operand.vmem [shape: f32[1,32], index: 4, kind: input, shape index: {}]   ;;  %s504_s5 = inlined_call_operand.vmem [shape: f32[1,32], index: 5, kind: input, shape index: {}]   ;;  %s505_s6 = inlined_call_operand.vmem [shape: f32[1,32], index: 6, kind: input, shape index: {}]   ;;  %s506_s7 = inlined_call_operand.hbm [shape: f32[16,32], index: 7, kind: output, shape index: {}]  }
   0x1   :  { %v345_v0 = vld [vmem:[%s500_s1] sm:$0xff]   ;;  %312 = vmatprep.subr.bf16.mxu0 %v387_v1  ;;  %v346_v2 = vld [vmem:[%s500_s1 + $0x8] sm:$0xff]   ;;  %320 = vmatprep.subr.bf16.mxu1 %v387_v1 }
   0x2   :  { %313 = vmatpush3.bf16.msra.mxu0 %v345_v0  ;;  %316 = vmatprep.mubr.msk.bf16.mxu0 %vm388_vm0, %v387_v1  ;;  %v28_v3 = vld [vmem:[%s499_s0] sm:$0xff]  ;;  %v29_v4 = vld [vmem:[%s499_s0 + $0x8] sm:$0xff] }
   0x3   :  { %314 = vmatprep.subr.bf16.mxu0 %v387_v1  ;;  %v347_v5 = vld [vmem:[%s502_s3] sm:$0xff]   ;;  %336 = vmatprep.mubr.msk.bf16.mxu1 %vm388_vm0, %v387_v1  ;;  %v348_v6 = vld [vmem:[%s502_s3 + $0x8] sm:$0xff]   ;;  %v30_v7 = vpack.c.bf16 %v29_v4, %v28_v3 }
   0x4   :  { %321 = vmatpush3.bf16.msra.mxu1 %v347_v5 }
   0x5   :  { %322 = vmatprep.subr.bf16.mxu1 %v387_v1 }
   0x6   :  { %315 = vmatpush3.bf16.msra.mxu0 %v346_v2 }
   0x8   :  { %323 = vmatpush3.bf16.msra.mxu1 %v348_v6 }
   0x9   :  { %317 = vmatmul.mubr.msk.bf16.vlgmr.msra.gmra.mrb[0].mxu0 %vm54_vm1, %v30_v7 }
   0xa   :  { %12 = vsyncpa [#allocation3], 0  ;;  %324 = vmatprep.subr.bf16.mxu1 %v387_v1  ;;  %v349_v8 = vld [vmem:[%s502_s3 + $0x10] sm:$0xff]   ;;  %v350_v9 = vld [vmem:[%s502_s3 + $0x18] sm:$0xff]   ;;  %s389_s28 = smov [#allocation2]  }
   0xb   :  { %v351_v10 = vld [vmem:[%s502_s3 + $0x20] sm:$0xff]   ;;  %v352_v11 = vld [vmem:[%s502_s3 + $0x28] sm:$0xff]   ;;  %v353_v12 = vld [vmem:[%s502_s3 + $0x30] sm:$0xff]   ;;  %s274_s29 = sshll.u32 %s389_s28, 4  ;;  %s275_s29 = int_to_ptr.vmem [resolvable:$true] %s274_s29 }
   0xc   :  { %325 = vmatpush3.bf16.msra.mxu1 %v349_v8  ;;  %v354_v13 = vld [vmem:[%s502_s3 + $0x38] sm:$0xff]   ;;  %v285_v14 = vld [vmem:[%s501_s2] ss:$0 sm:$0xff]  ;;  %s363_s30 = scalar_lea.vmem %s275_s29, 256  ;;  %p368_p1 = scmp.lt.s32.totalorder %s275_s29, %s275_s29 }
   0xd   :  { %326 = vmatprep.subr.bf16.mxu1 %v387_v1  ;;  %v289_v32 = vld [vmem:[%s503_s4] ss:$0 sm:$0xff]  ;;  %p364_p0 = scmp.ne.s32.totalorder %s275_s29, %s363_s30  ;;  %p369_p2 = scmp.lt.s32.totalorder %s363_s30, %s363_s30 }
   0xe   :  { %v298_v58 = vld [vmem:[%s504_s5] ss:$0 sm:$0xff] }
   0xf   :  { %v299_v60 = vld [vmem:[%s505_s6] ss:$0 sm:$0xff]  ;;  %p370_p3 = por %p369_p2, %p368_p1 }
  0x10   :  { %327 = vmatpush3.bf16.msra.mxu1 %v350_v9 }
  0x11   :  { %328 = vmatprep.subr.bf16.mxu1 %v387_v1  ;;  %p371_p4 = pnand %p370_p3, %p364_p0 }
  0x14   :  { %329 = vmatpush3.bf16.msra.mxu1 %v351_v10 }
  0x15   :  { %330 = vmatprep.subr.bf16.mxu1 %v387_v1 }
  0x18   :  { %331 = vmatpush3.bf16.msra.mxu1 %v352_v11 }
  0x19   :  { %332 = vmatprep.subr.bf16.mxu1 %v387_v1 }
  0x1c   :  { %333 = vmatpush3.bf16.msra.mxu1 %v353_v12 }
  0x1d   :  { %334 = vmatprep.subr.bf16.mxu1 %v387_v1 }
  0x20   :  { %335 = vmatpush3.bf16.msra.mxu1 %v354_v13 }
  0xdc   :  { %v92_v15 = vpop.f32.mrb[0].mxu0 }
  0xdd   :  { %v93_v16 = vadd.f32 %v285_v14, %v92_v15  ;;  %v318_v17 = vpop.f32.mrb[1].mxu0 }
  0xde   :  { %v95_v18 = vpop.f32.mrb[2].mxu0 }
  0xdf   :  { %v101_v19 = vmul.f32 0.70710677, %v93_v16  ;;  %v96_v20 = vadd.f32 %v285_v14, %v95_v18  ;;  %v319_v21 = vpop.f32.mrb[3].mxu0  ;;  %v99_v26 = vmul.f32 0.5, %v93_v16 }
  0xe1   :  { %355 = verf.f32 %v101_v19  ;;  %v102_v22 = vmul.f32 0.70710677, %v96_v20  ;;  %v100_v27 = vmul.f32 0.5, %v96_v20 }
  0xe3   :  { %357 = verf.f32 %v102_v22 }
  0xeb   :  { %v356_v23 = vpop.eup %355 }
  0xec   :  { %v105_v24 = vadd.f32 1.0, %v356_v23 }
  0xed   :  { %v358_v25 = vpop.eup %357 }
  0xee   :  { %v106_v28 = vadd.f32 1.0, %v358_v25  ;;  %v107_v29 = vmul.f32 %v105_v24, %v99_v26 }
  0xf0   :  { %v108_v30 = vmul.f32 %v106_v28, %v100_v27 }
  0xf2   :  { %v109_v31 = vpack.c.bf16 %v108_v30, %v107_v29 }
  0xf4   :  { %337 = vmatmul.mubr.bf16.vlgmr.msra.gmra.mrb[0].mxu1 %v109_v31 }
 0x1c7   :  { %v215_v33 = vpop.f32.mrb[0].mxu1 }
 0x1c8   :  { %v216_v34 = vadd.f32 %v289_v32, %v215_v33  ;;  %v338_v35 = vpop.f32.mrb[1].mxu1 }
 0x1c9   :  { %v218_v36 = vpop.f32.mrb[2].mxu1 }
 0x1ca   :  { %v219_v37 = vadd.f32 %v289_v32, %v218_v36  ;;  %v339_v38 = vpop.f32.mrb[3].mxu1  ;;  %v222_v39 = vsel %vm54_vm1, %v216_v34, 0.0 }
 0x1cb   :  { %223 = vadd.xlane.f32.xlu0 %v222_v39 }
 0x1cc   :  { %v225_v40 = vsel %vm54_vm1, %v219_v37, 0.0 }
 0x1cf   :  { %226 = vadd.xlane.f32.xlu0 %v225_v40 }
 0x258   :  { %v224_v41 = vpop.xlane.xlu0 %223 }
 0x259   :  { %v229_v42 = vmul.f32 0.03125, %v224_v41 }
 0x25b   :  { %v231_v43 = vsub.f32 %v216_v34, %v229_v42 }
 0x25c   :  { %v227_v44 = vpop.xlane.xlu0 %226 }
 0x25d   :  { %v230_v45 = vmul.f32 0.03125, %v227_v44  ;;  %v233_v46 = vmul.f32 %v231_v43, %v231_v43 }
 0x25f   :  { %v232_v47 = vsub.f32 %v219_v37, %v230_v45  ;;  %v235_v48 = vsel %vm54_vm1, %v233_v46, 0.0 }
 0x260   :  { %236 = vadd.xlane.f32.xlu1 %v235_v48 }
 0x261   :  { %v234_v49 = vmul.f32 %v232_v47, %v232_v47 }
 0x263   :  { %v238_v50 = vsel %vm54_vm1, %v234_v49, 0.0 }
 0x264   :  { %239 = vadd.xlane.f32.xlu1 %v238_v50 }
 0x2ed   :  { %v237_v51 = vpop.xlane.xlu1 %236 }
 0x2ee   :  { %v241_v52 = vmul.f32 0.03125, %v237_v51 }
 0x2f0   :  { %v243_v53 = vadd.f32 1e-12, %v241_v52 }
 0x2f1   :  { %v240_v54 = vpop.xlane.xlu1 %239 }
 0x2f2   :  { %359 = vrsqrt.f32 %v243_v53  ;;  %v242_v55 = vmul.f32 0.03125, %v240_v54 }
 0x2f4   :  { %v244_v56 = vadd.f32 1e-12, %v242_v55 }
 0x2f6   :  { %361 = vrsqrt.f32 %v244_v56 }
 0x2fc   :  { %v360_v57 = vpop.eup %359 }
 0x2fd   :  { %v247_v59 = vmul.f32 %v360_v57, %v231_v43 }
 0x2ff   :  { %v256_v61 = vmul.f32 %v298_v58, %v247_v59 }
 0x300   :  { %v362_v62 = vpop.eup %361 }
 0x301   :  { %v248_v63 = vmul.f32 %v362_v62, %v232_v47  ;;  %v265_v0 = vadd.f32 %v299_v60, %v256_v61 }
 0x303   :  { %v257_v1 = vmul.f32 %v298_v58, %v248_v63  ;;  %267 = vst.msk [vmem:[#allocation2] sm:$0xff] %vm54_vm1, %v265_v0 }
 0x305   :  { %v266_v2 = vadd.f32 %v299_v60, %v257_v1 }
 0x307   :  { %268 = vst.msk [vmem:[#allocation2 + $0x8] sm:$0xff] %vm54_vm1, %v266_v2 }
 0x308   :  { %374 = shalt.err (!%p371_p4)
}
 0x309   :  { %s375_s8 = scalar_lea.hbm %s506_s7, 256 }
 0x30a   :  { %p376_p5 = scmp.ne.s32.totalorder %s506_s7, %s375_s8  ;;  %p379_p6 = scmp.lt.u32.totalorder %s375_s8, %s506_s7 }
 0x30c   :  { %p381_p7 = pnand %p379_p6, %p376_p5 }
 0x30e   :  { %384 = shalt.err (!%p381_p7)
}
 0x30f   :  { %s390_s0 = smov 128   ;;  %s391_s12 = smov 8  }
 0x310   :  { %280 = dma.vmem_to_hbm [thread:$0]  %s275_s29, 256, %s506_s7, [#allocation3], %s390_s0, %s390_s0, %s391_s12  }
 0x311   :  { %385 = dma.done.wait [#allocation3], 256  }
 0x312   :  { %386 = vsyncadd [#allocation3], 4294967040 }
 0x313   :  { %284 = vsyncpa [#allocation3], 1 }

</bundles_post_ra>
